<compile_context>
chip_gen: v6e
topology: v6e:2x2x1
jax: 0.10.0
libtpu: 0.0.40
codegen_flags: <defaults>
</compile_context>

<pallas_src>
import math
import numpy as np
import jax
import jax.numpy as jnp
from jax.experimental import pallas as pl
from jax.experimental.pallas import tpu as pltpu

# ---- module hyper-parameters (module defaults at small shapes) ----
EMBED_DIM = 32
N_HEAD = 2
HIDDEN_DIM = EMBED_DIM // N_HEAD        # 16  (hidden_dim=None -> embed_dim // n_head)
OUT_DIM = EMBED_DIM                     # 32  (out_dim=None -> embed_dim)
MB = 2                                  # batch
K_LEN = 8
Q_LEN = 8

NHH = N_HEAD * HIDDEN_DIM               # 32
N_KROWS = MB * K_LEN                    # 16
N_QROWS = MB * Q_LEN                    # 16
N_BLK = N_HEAD * MB                     # 4   (head,batch) blocks in the stacked layout

# ---- parameter-slab layout (8-aligned sublane offsets, 64 lanes wide) ----
SLAB_W = 2 * NHH                        # 64
ROW_WKQ = 0                             # rows [0,32):   [w_k | w_q]  (32, 64)
ROW_BKQ = 32                            # row  32:       [b_k | b_q]  (1, 64)
ROW_WP = 40                             # rows [40,72):  w_proj       (32, 32) in lanes [0,32)
ROW_BP = 72                             # row  72:       b_proj       (1, 32)  in lanes [0,32)
ROW_MASK = 80                           # rows [80,112): block-diag mask (32, 32)
PARAM_ROWS = ROW_MASK + N_BLK * Q_LEN   # 112

OUT_W = OUT_DIM + N_HEAD * K_LEN        # 48 (lane-dense packed output+score)


def attention_kernel(kq_ref, p_ref, out_ref):
    """Whole forward pass, single invocation, 4 MXU issues.

    kq_ref:  (MB*(K_LEN+Q_LEN), EMBED_DIM) = (32, 32); k rows then q rows, (b, pos) order.
    p_ref:   (PARAM_ROWS, SLAB_W) = (112, 64) packed parameter + mask slab.
    out_ref: (MB*Q_LEN, OUT_W) = (16, 48); lanes [0:32) output, [32:48) scores (h,k).
    """
    # ---- static parameter slices (slab DMA'd once; slices are free) ----
    wkq = p_ref[ROW_WKQ:ROW_WKQ + EMBED_DIM, :]                  # (32, 64)  [w_k | w_q]
    bkq = p_ref[ROW_BKQ:ROW_BKQ + 1, :]                          # (1, 64)   [b_k | b_q]
    wp = p_ref[ROW_WP:ROW_WP + NHH, 0:OUT_DIM]                   # (32, 32)
    bp = p_ref[ROW_BP:ROW_BP + 1, 0:OUT_DIM]                     # (1, 32)
    mask = p_ref[ROW_MASK:ROW_MASK + N_BLK * Q_LEN, 0:N_BLK * K_LEN]  # (32, 32)

    # ---- fused K/Q projection: one MXU issue ----
    # rows [0:16) x lanes [0:32)  -> k @ w_k + b_k
    # rows [16:32) x lanes [32:64) -> q @ w_q + b_q   (crossed terms unused)
    proj = jnp.dot(kq_ref[...], wkq, preferred_element_type=jnp.float32) + bkq  # (32, 64)

    kx = proj[0:N_KROWS, 0:NHH]                       # (16, 32) rows (b,k), lanes (h,hid)
    qx = proj[N_KROWS:N_KROWS + N_QROWS, NHH:2 * NHH]  # (16, 32) rows (b,q), lanes (h,hid)

    # ---- stack heads along sublanes: rows ordered (h, b, pos) ----
    kx_s = jnp.concatenate(
        [kx[:, h * HIDDEN_DIM:(h + 1) * HIDDEN_DIM] for h in range(N_HEAD)], axis=0)  # (32, 16)
    qx_s = jnp.concatenate(
        [qx[:, h * HIDDEN_DIM:(h + 1) * HIDDEN_DIM] for h in range(N_HEAD)], axis=0)  # (32, 16)

    # ---- one score matmul covers every (head, batch) block ----
    s = jax.lax.dot_general(qx_s, kx_s, (((1,), (1,)), ((), ())),
                            preferred_element_type=jnp.float32) + mask   # (32, 32)
    m = jnp.max(s, axis=-1, keepdims=True)
    e = jnp.exp(s - m)                       # masked (-1e30) entries underflow to exactly 0
    l = jnp.sum(e, axis=-1, keepdims=True)
    p = e / l                                # softmax; rows (h,b,q), cols (h',b',k)

    # ---- one attention matmul for all heads / batches ----
    out_s = jnp.dot(p, kx_s, preferred_element_type=jnp.float32)         # (32, 16) rows (h,b,q)

    # ---- un-stack heads onto lanes, single output-projection matmul ----
    out_cat = jnp.concatenate(
        [out_s[h * N_QROWS:(h + 1) * N_QROWS, :] for h in range(N_HEAD)], axis=1)  # (16, 32)
    out_ref[:, 0:OUT_DIM] = (
        jnp.dot(out_cat, wp, preferred_element_type=jnp.float32) + bp)

    # ---- collapse exactly-zero off-block score columns, lane-pack per head ----
    pd = p[:, 0:K_LEN]
    for blk in range(1, N_BLK):
        pd = pd + p[:, blk * K_LEN:(blk + 1) * K_LEN]                    # (32, 8) rows (h,b,q)
    score16 = jnp.concatenate(
        [pd[h * N_QROWS:(h + 1) * N_QROWS, :] for h in range(N_HEAD)], axis=1)  # (16, 16)
    out_ref[:, OUT_DIM:OUT_DIM + N_HEAD * K_LEN] = score16


def pack_params(params):
    """One-time ('init') packing of all parameters + the block-diagonal mask
    into a single lane-dense f32 slab (one DMA descriptor at kernel launch)."""
    wk, bk, wq, bq, wp, bp = [np.asarray(a, np.float32) for a in params]
    slab = np.zeros((PARAM_ROWS, SLAB_W), np.float32)
    slab[ROW_WKQ:ROW_WKQ + EMBED_DIM, 0:NHH] = wk
    slab[ROW_WKQ:ROW_WKQ + EMBED_DIM, NHH:2 * NHH] = wq
    slab[ROW_BKQ, 0:NHH] = bk[0]
    slab[ROW_BKQ, NHH:2 * NHH] = bq[0]
    slab[ROW_WP:ROW_WP + NHH, 0:OUT_DIM] = wp
    slab[ROW_BP, 0:OUT_DIM] = bp[0]
    # Block-diagonal (head, batch) mask for the head/batch-stacked score matmul.
    r = np.arange(N_BLK * Q_LEN)[:, None] // Q_LEN
    c = np.arange(N_BLK * K_LEN)[None, :] // K_LEN
    slab[ROW_MASK:ROW_MASK + N_BLK * Q_LEN, 0:N_BLK * K_LEN] = np.where(r == c, 0.0, -1e30)
    return jnp.asarray(slab)


def attention_forward(k, q, param_slab):
    """Returns (output, score) matching the PyTorch module's forward().

    output: (MB, Q_LEN, OUT_DIM)
    score:  (N_HEAD*MB, Q_LEN, K_LEN)
    """
    # Single packed activation input: k rows then q rows (free reshapes + one concat).
    kq = jnp.concatenate([k.reshape(MB * K_LEN, EMBED_DIM),
                          q.reshape(MB * Q_LEN, EMBED_DIM)], axis=0)      # (32, 32)

    packed = pl.pallas_call(
        attention_kernel,
        out_shape=jax.ShapeDtypeStruct((N_QROWS, OUT_W), jnp.float32),
        in_specs=[
            pl.BlockSpec(memory_space=pltpu.MemorySpace.VMEM),   # kq (whole array)
            pl.BlockSpec(memory_space=pltpu.MemorySpace.VMEM),   # parameter slab
        ],
        out_specs=pl.BlockSpec(memory_space=pltpu.MemorySpace.VMEM),
    )(kq, param_slab)

    out = packed[:, 0:OUT_DIM].reshape(MB, Q_LEN, OUT_DIM)
    # scores: rows (b,q), lanes (h,k) -> (N_HEAD*MB, Q_LEN, K_LEN) with (h,b) row order.
    score = packed[:, OUT_DIM:OUT_W].reshape(MB, Q_LEN, N_HEAD, K_LEN)
    score = score.transpose(2, 0, 1, 3).reshape(N_HEAD * MB, Q_LEN, K_LEN)
    return out, score


def attention_reference(k, q, params):
    """Pure-JAX mirror of the PyTorch forward (dot_product) for verification."""
    wk, bk, wq, bq, wp, bp = params
    kx = k @ wk + bk          # (MB, K_LEN, N_HEAD*HID)
    qx = q @ wq + bq          # (MB, Q_LEN, N_HEAD*HID)
    kx = kx.reshape(MB, K_LEN, N_HEAD, HIDDEN_DIM).transpose(2, 0, 1, 3).reshape(-1, K_LEN, HIDDEN_DIM)
    qx = qx.reshape(MB, Q_LEN, N_HEAD, HIDDEN_DIM).transpose(2, 0, 1, 3).reshape(-1, Q_LEN, HIDDEN_DIM)
    score = jnp.einsum('bqd,bkd->bqk', qx, kx)
    score = jax.nn.softmax(score, axis=-1)
    out = jnp.einsum('bqk,bkd->bqd', score, kx)                     # (N_HEAD*MB, Q_LEN, HID)
    out = jnp.concatenate(jnp.split(out, N_HEAD, axis=0), axis=-1)  # (MB, Q_LEN, N_HEAD*HID)
    out = out @ wp + bp
    return out, score


def init_params(key):
    """Deterministic synthetic init (PyTorch-Linear-like uniform ranges)."""
    ks = jax.random.split(key, 6)
    lim_kq = 1.0 / math.sqrt(EMBED_DIM)
    lim_p = 1.0 / math.sqrt(NHH)
    wk = jax.random.uniform(ks[0], (EMBED_DIM, NHH), jnp.float32, -lim_kq, lim_kq)
    bk = jax.random.uniform(ks[1], (1, NHH), jnp.float32, -lim_kq, lim_kq)
    wq = jax.random.uniform(ks[2], (EMBED_DIM, NHH), jnp.float32, -lim_kq, lim_kq)
    bq = jax.random.uniform(ks[3], (1, NHH), jnp.float32, -lim_kq, lim_kq)
    wp = jax.random.uniform(ks[4], (NHH, OUT_DIM), jnp.float32, -lim_p, lim_p)
    bp = jax.random.uniform(ks[5], (1, OUT_DIM), jnp.float32, -lim_p, lim_p)
    return wk, bk, wq, bq, wp, bp


if __name__ == "__main__":
    key = jax.random.PRNGKey(0)
    k_key, q_key, p_key = jax.random.split(key, 3)

    k = jax.random.normal(k_key, (MB, K_LEN, EMBED_DIM), jnp.float32)
    q = jax.random.normal(q_key, (MB, Q_LEN, EMBED_DIM), jnp.float32)
    params = init_params(p_key)
    param_slab = pack_params(params)          # one-time parameter packing ("init")

    out, score = attention_forward(k, q, param_slab)
    jax.block_until_ready((out, score))

    ref_out, ref_score = attention_reference(k, q, params)
    assert out.shape == (MB, Q_LEN, OUT_DIM)
    assert score.shape == (N_HEAD * MB, Q_LEN, K_LEN)
    assert jnp.allclose(out, ref_out, atol=1e-5, rtol=1e-5)
    assert jnp.allclose(score, ref_score, atol=1e-5, rtol=1e-5)

    print("KERNEL_OK")
</pallas_src>

<mosaic_0001>
module attributes {stable_mosaic.version = 11 : i64} {
  func.func @attention_kernel(%arg0: memref<32x32xf32, #tpu.memory_space<vmem>>, %arg1: memref<112x64xf32, #tpu.memory_space<vmem>>, %arg2: memref<16x48xf32, #tpu.memory_space<vmem>>) attributes {dimension_semantics = [], scalar_prefetch = 0 : i64, scratch_operands = 0 : i64, tpu.core_type = #tpu.core_type<tc>} {
    %c0 = arith.constant 0 : index
    %c0_0 = arith.constant 0 : index
    %0 = vector.load %arg1[%c0, %c0_0] : memref<112x64xf32, #tpu.memory_space<vmem>>, vector<32x64xf32>
    %c32 = arith.constant 32 : index
    %c0_1 = arith.constant 0 : index
    %1 = vector.load %arg1[%c32, %c0_1] : memref<112x64xf32, #tpu.memory_space<vmem>>, vector<1x64xf32>
    %c40 = arith.constant 40 : index
    %c0_2 = arith.constant 0 : index
    %2 = vector.load %arg1[%c40, %c0_2] : memref<112x64xf32, #tpu.memory_space<vmem>>, vector<32x32xf32>
    %c72 = arith.constant 72 : index
    %c0_3 = arith.constant 0 : index
    %3 = vector.load %arg1[%c72, %c0_3] : memref<112x64xf32, #tpu.memory_space<vmem>>, vector<1x32xf32>
    %c80 = arith.constant 80 : index
    %c0_4 = arith.constant 0 : index
    %4 = vector.load %arg1[%c80, %c0_4] : memref<112x64xf32, #tpu.memory_space<vmem>>, vector<32x32xf32>
    %c0_5 = arith.constant 0 : index
    %c0_6 = arith.constant 0 : index
    %5 = vector.load %arg0[%c0_5, %c0_6] : memref<32x32xf32, #tpu.memory_space<vmem>>, vector<32x32xf32>
    %cst = arith.constant dense<0.000000e+00> : vector<32x64xf32>
    %6 = tpu.matmul %5, %0, %cst {dimension_numbers = #tpu.dot_dimension_numbers<[1], [0], [0], [1], [0, 0, 1, 1], [], []>} : vector<32x32xf32>, vector<32x64xf32>, vector<32x64xf32> -> vector<32x64xf32>
    %7 = vector.broadcast %1 : vector<1x64xf32> to vector<32x64xf32>
    %8 = arith.addf %6, %7 : vector<32x64xf32>
    %9 = vector.extract_strided_slice %8 {offsets = [0, 0], sizes = [16, 32], strides = [1, 1]} : vector<32x64xf32> to vector<16x32xf32>
    %10 = vector.extract_strided_slice %8 {offsets = [16, 32], sizes = [16, 32], strides = [1, 1]} : vector<32x64xf32> to vector<16x32xf32>
    %11 = vector.extract_strided_slice %9 {offsets = [0, 0], sizes = [16, 16], strides = [1, 1]} : vector<16x32xf32> to vector<16x16xf32>
    %12 = vector.extract_strided_slice %9 {offsets = [0, 16], sizes = [16, 16], strides = [1, 1]} : vector<16x32xf32> to vector<16x16xf32>
    %13 = tpu.concatenate %11, %12 in 0 : vector<16x16xf32>, vector<16x16xf32> -> vector<32x16xf32>
    %14 = vector.extract_strided_slice %10 {offsets = [0, 0], sizes = [16, 16], strides = [1, 1]} : vector<16x32xf32> to vector<16x16xf32>
    %15 = vector.extract_strided_slice %10 {offsets = [0, 16], sizes = [16, 16], strides = [1, 1]} : vector<16x32xf32> to vector<16x16xf32>
    %16 = tpu.concatenate %14, %15 in 0 : vector<16x16xf32>, vector<16x16xf32> -> vector<32x16xf32>
    %cst_7 = arith.constant dense<0.000000e+00> : vector<32x32xf32>
    %17 = tpu.matmul %16, %13, %cst_7 {dimension_numbers = #tpu.dot_dimension_numbers<[1], [1], [0], [0], [0, 0, 1, 0], [], []>} : vector<32x16xf32>, vector<32x16xf32>, vector<32x32xf32> -> vector<32x32xf32>
    %18 = arith.addf %17, %4 : vector<32x32xf32>
    %cst_8 = arith.constant dense<0xFF800000> : vector<32xf32>
    %19 = vector.multi_reduction <maximumf>, %18, %cst_8 [1] : vector<32x32xf32> to vector<32xf32>
    %20 = vector.shape_cast %19 : vector<32xf32> to vector<32x1xf32>
    %21 = vector.broadcast %20 : vector<32x1xf32> to vector<32x32xf32>
    %22 = arith.subf %18, %21 : vector<32x32xf32>
    %23 = math.exp %22 : vector<32x32xf32>
    %cst_9 = arith.constant dense<0.000000e+00> : vector<32xf32>
    %24 = vector.multi_reduction <add>, %23, %cst_9 [1] : vector<32x32xf32> to vector<32xf32>
    %25 = vector.shape_cast %24 : vector<32xf32> to vector<32x1xf32>
    %26 = vector.broadcast %25 : vector<32x1xf32> to vector<32x32xf32>
    %27 = arith.divf %23, %26 : vector<32x32xf32>
    %cst_10 = arith.constant dense<0.000000e+00> : vector<32x16xf32>
    %28 = tpu.matmul %27, %13, %cst_10 {dimension_numbers = #tpu.dot_dimension_numbers<[1], [0], [0], [1], [0, 0, 1, 1], [], []>} : vector<32x32xf32>, vector<32x16xf32>, vector<32x16xf32> -> vector<32x16xf32>
    %29 = vector.extract_strided_slice %28 {offsets = [0, 0], sizes = [16, 16], strides = [1, 1]} : vector<32x16xf32> to vector<16x16xf32>
    %30 = vector.extract_strided_slice %28 {offsets = [16, 0], sizes = [16, 16], strides = [1, 1]} : vector<32x16xf32> to vector<16x16xf32>
    %31 = tpu.concatenate %29, %30 in 1 : vector<16x16xf32>, vector<16x16xf32> -> vector<16x32xf32>
    %cst_11 = arith.constant dense<0.000000e+00> : vector<16x32xf32>
    %32 = tpu.matmul %31, %2, %cst_11 {dimension_numbers = #tpu.dot_dimension_numbers<[1], [0], [0], [1], [0, 0, 1, 1], [], []>} : vector<16x32xf32>, vector<32x32xf32>, vector<16x32xf32> -> vector<16x32xf32>
    %33 = vector.broadcast %3 : vector<1x32xf32> to vector<16x32xf32>
    %34 = arith.addf %32, %33 : vector<16x32xf32>
    %c0_12 = arith.constant 0 : index
    %c0_13 = arith.constant 0 : index
    %35 = vector.load %arg2[%c0_12, %c0_13] : memref<16x48xf32, #tpu.memory_space<vmem>>, vector<16x32xf32>
    tpu.vector_store %arg2[%c0_12, %c0_13], %34 {strides = array<i32>} : memref<16x48xf32, #tpu.memory_space<vmem>>, vector<16x32xf32>,
    %36 = vector.extract_strided_slice %27 {offsets = [0, 0], sizes = [32, 8], strides = [1, 1]} : vector<32x32xf32> to vector<32x8xf32>
    %37 = vector.extract_strided_slice %27 {offsets = [0, 8], sizes = [32, 8], strides = [1, 1]} : vector<32x32xf32> to vector<32x8xf32>
    %38 = arith.addf %36, %37 : vector<32x8xf32>
    %39 = vector.extract_strided_slice %27 {offsets = [0, 16], sizes = [32, 8], strides = [1, 1]} : vector<32x32xf32> to vector<32x8xf32>
    %40 = arith.addf %38, %39 : vector<32x8xf32>
    %41 = vector.extract_strided_slice %27 {offsets = [0, 24], sizes = [32, 8], strides = [1, 1]} : vector<32x32xf32> to vector<32x8xf32>
    %42 = arith.addf %40, %41 : vector<32x8xf32>
    %43 = vector.extract_strided_slice %42 {offsets = [0, 0], sizes = [16, 8], strides = [1, 1]} : vector<32x8xf32> to vector<16x8xf32>
    %44 = vector.extract_strided_slice %42 {offsets = [16, 0], sizes = [16, 8], strides = [1, 1]} : vector<32x8xf32> to vector<16x8xf32>
    %45 = tpu.concatenate %43, %44 in 1 : vector<16x8xf32>, vector<16x8xf32> -> vector<16x16xf32>
    %c0_14 = arith.constant 0 : index
    %c32_15 = arith.constant 32 : index
    %46 = vector.load %arg2[%c0_14, %c32_15] : memref<16x48xf32, #tpu.memory_space<vmem>>, vector<16x16xf32>
    tpu.vector_store %arg2[%c0_14, %c32_15], %45 {strides = array<i32>} : memref<16x48xf32, #tpu.memory_space<vmem>>, vector<16x16xf32>,
    return
  }
}

</mosaic_0001>

<bundles_post_ra>
// kernel: tpu_custom_call.1
= control target key start
LH: loop header
LB: loop body
LE: loop exit
PB: predicated region body
PF: predicated region fallthrough
CT: control target
= control target key end

     0   :  { %vm34_vm0 = vcmask 261120   ;;  %s870_s0 = inlined_call_operand.vmem [shape: f32[32,32], index: 0, kind: input, shape index: {}]   ;;  %s871_s1 = inlined_call_operand.vmem [shape: f32[112,64], index: 1, kind: input, shape index: {}]   ;;  %s872_s2 = inlined_call_operand.hbm [shape: f32[16,48], index: 2, kind: output, shape index: {}]  }
   0x1   :  { %v15_v0 = vld [vmem:[%s871_s1 + $0x18] sm:$0xff]  ;;  %v14_v1 = vld [vmem:[%s871_s1 + $0x10] sm:$0xff]  ;;  %v26_v2 = vld [vmem:[%s870_s0] sm:$0xff] }
   0x2   :  { %630 = vmatprep.subr.mxu0 %v15_v0  ;;  %v13_v3 = vld [vmem:[%s871_s1 + $0x8] sm:$0xff]  ;;  %638 = vmatprep.mubr.msk.f32.mxu0 %vm34_vm0, %v26_v2 }
   0x3   :  { %631 = vmatpush3.msra.mxu0 %v15_v0 }
   0x4   :  { %7 = vsyncpa [#allocation3], 0  ;;  %632 = vmatprep.subr.mxu0 %v14_v1  ;;  %v12_v4 = vld [vmem:[%s871_s1] sm:$0xff]  ;;  %v27_v5 = vld [vmem:[%s870_s0 + $0x8] sm:$0xff]  ;;  %s730_s27 = smov 112   ;;  %vm154_vm1 = vcmask 130048  }
   0x5   :  { %633 = vmatpush3.msra.mxu0 %v14_v1  ;;  %v28_v6 = vld [vmem:[%s870_s0 + $0x10] sm:$0xff]  ;;  %v29_v7 = vld [vmem:[%s870_s0 + $0x18] sm:$0xff]  ;;  %v580_v8 = vld [vmem:[%s871_s1 + $0x20] ss:$0 sm:$0xff]  ;;  %s731_s0 = smov 96   ;;  %s732_s16 = smov 16  }
   0x6   :  { %634 = vmatprep.subr.mxu0 %v13_v3  ;;  %v23_v25 = vld [vmem:[%s871_s1 + $0x58] sm:$0xff]  ;;  %v22_v27 = vld [vmem:[%s871_s1 + $0x50] sm:$0xff]  ;;  %v24_v34 = vld [vmem:[%s871_s1 + $0x60] sm:$0xff]  ;;  %s733_s17 = smov 120   ;;  %s734_s18 = smov 104   ;;  %vm550_vm2 = vcmask 64512  }
   0x7   :  { %635 = vmatpush3.msra.mxu0 %v13_v3  ;;  %v25_v35 = vld [vmem:[%s871_s1 + $0x68] sm:$0xff]  ;;  %s735_s19 = smov 8   ;;  %s736_s20 = smov 32   ;;  %vm561_vm3 = vcmask 392448  }
   0x8   :  { %636 = vmatprep.subr.mxu0 %v12_v4  ;;  %s737_s23 = smov [#allocation2]  }
   0x9   :  { %637 = vmatpush3.msra.mxu0 %v12_v4  ;;  %s569_s24 = sshll.u32 %s737_s23, 4  ;;  %s570_s24 = int_to_ptr.vmem [resolvable:$true] %s569_s24 }
   0xa   :  { %639 = vmatmul.mubr.msk.f32.vlgmr.msra.gmra.mxu0 %vm34_vm0, %v27_v5  ;;  %s708_s25 = scalar_lea.vmem %s570_s24, 256  ;;  %p713_p1 = scmp.lt.s32.totalorder %s570_s24, %s570_s24 }
   0xb   :  { %641 = vmatprep.mubr.msk.f32.mxu0 %vm34_vm0, %v28_v6  ;;  %p709_p0 = scmp.ne.s32.totalorder %s570_s24, %s708_s25  ;;  %p714_p2 = scmp.lt.s32.totalorder %s708_s25, %s708_s25 }
   0xd   :  { %p715_p3 = por %p714_p2, %p713_p1 }
   0xe   :  { %642 = vmatmul.mubr.msk.f32.gmra.mxu0 %vm34_vm0, %v29_v7 }
   0xf   :  { %p716_p4 = pnand %p715_p3, %p709_p0 }
  0xca   :  { %v640_v9 = vpop.f32.mrf.mxu0 }
  0xcb   :  { %v119_v10 = vadd.f32 %v640_v9, %v580_v8  ;;  %v20_v9 = vld [vmem:[%s871_s1 + $0x40] sm:$0xff] }
  0xcc   :  { %v113_v11 = vpop.f32.mrf.mxu0 }
  0xcd   :  { %136 = vrot.lane.b32.xlu1 %v119_v10, %s730_s27  ;;  %v114_v13 = vadd.f32 %v580_v8, %v113_v11  ;;  %v18_v11 = vld [vmem:[%s871_s1 + $0x30] sm:$0xff] }
  0xce   :  { %v643_v12 = vpop.f32.mrf.mxu0 }
  0xcf   :  { %v129_v16 = vadd.f32 %v643_v12, %v580_v8  ;;  %v17_v12 = vld [vmem:[%s871_s1 + $0x28] sm:$0xff] }
  0xd0   :  { %v123_v14 = vpop.f32.mrf.mxu0 }
  0xd1   :  { %v124_v15 = vadd.f32 %v580_v8, %v123_v14  ;;  %134 = vrot.lane.b32.xlu1 %v114_v13, %s730_s27 }
  0xd3   :  { %142 = vrot.lane.b32.xlu0 %v124_v15, %s730_s27 }
  0xd5   :  { %148 = vrot.lane.b32.xlu1 %v129_v16, %s731_s0 }
  0xd7   :  { %144 = vrot.lane.b32.xlu0 %v129_v16, %s730_s27 }
  0xdb   :  { %146 = vrot.lane.b32.xlu0 %v124_v15, %s731_s0 }
 0x13f   :  { %v137_v17 = vpop.permute.xlu1 %136 }
 0x140   :  { %644 = vmatprep.subr.msk.mxu1 %vm154_vm1, %v137_v17  ;;  %658 = vmatprep.subr.mxu0 %v137_v17 }
 0x141   :  { %645 = vmatpush3.xpose.msk.msra.mxu1 %vm154_vm1, %v137_v17  ;;  %659 = vmatpush3.msra.mxu0 %v137_v17 }
 0x143   :  { %v135_v18 = vpop.permute.xlu1 %134 }
 0x144   :  { %646 = vmatprep.subr.msk.mxu1 %vm154_vm1, %v135_v18  ;;  %660 = vmatprep.subr.mxu0 %v135_v18 }
 0x145   :  { %v143_v19 = vpop.permute.xlu0 %142  ;;  %647 = vmatpush3.xpose.msk.msra.mxu1 %vm154_vm1, %v135_v18  ;;  %661 = vmatpush3.msra.mxu0 %v135_v18 }
 0x146   :  { %150 = vrot.lane.b32.xlu0 %v143_v19, %s731_s0  ;;  %648 = vmatprep.subr.msk.mxu1 %vm154_vm1, %v119_v10 }
 0x147   :  { %662 = vmatprep.subr.mxu0 %v119_v10  ;;  %v149_v22 = vpop.permute.xlu1 %148 }
 0x148   :  { %663 = vmatpush3.msra.mxu0 %v119_v10 }
 0x149   :  { %664 = vmatprep.subr.mxu0 %v114_v13  ;;  %v145_v20 = vpop.permute.xlu0 %144  ;;  %649 = vmatpush3.xpose.msk.msra.mxu1 %vm154_vm1, %v119_v10  ;;  %v19_v10 = vld [vmem:[%s871_s1 + $0x38] sm:$0xff] }
 0x14a   :  { %665 = vmatpush3.msra.mxu0 %v114_v13  ;;  %152 = vrot.lane.b32.xlu1 %v145_v20, %s731_s0 }
 0x14b   :  { %650 = vmatprep.subr.msk.mxu1 %vm154_vm1, %v114_v13  ;;  %672 = vmatprep.subr.mxu0 %v20_v9 }
 0x14d   :  { %v147_v21 = vpop.permute.xlu0 %146  ;;  %651 = vmatpush3.xpose.msk.msra.mxu1 %vm154_vm1, %v114_v13 }
 0x14e   :  { %652 = vmatprep.mubr.msk.f32.mxu1 %vm154_vm1, %v147_v21 }
 0x150   :  { %653 = vmatmul.mubr.msk.f32.vlgmr.msra.gmra.mxu1 %vm154_vm1, %v149_v22 }
 0x1b8   :  { %v151_v23 = vpop.permute.xlu0 %150 }
 0x1b9   :  { %655 = vmatprep.mubr.msk.f32.mxu1 %vm154_vm1, %v151_v23 }
 0x1bc   :  { %v153_v24 = vpop.permute.xlu1 %152 }
 0x1bd   :  { %656 = vmatmul.mubr.msk.f32.gmra.mxu1 %vm154_vm1, %v153_v24 }
 0x210   :  { %v654_v26 = vpop.f32.mrf.mxu1 }
 0x211   :  { %v243_v28 = vadd.f32 %v654_v26, %v23_v25 }
 0x212   :  { %v237_v29 = vpop.f32.mrf.mxu1 }
 0x213   :  { %v238_v30 = vadd.f32 %v237_v29, %v22_v27  ;;  %v259_v31 = vsel %vm34_vm0, %v243_v28, -inf }
 0x214   :  { %260 = vmax.xlane.f32.xlu1 %v259_v31 }
 0x215   :  { %v256_v32 = vsel %vm34_vm0, %v238_v30, -inf }
 0x216   :  { %257 = vmax.xlane.f32.xlu0 %v256_v32 }
 0x27d   :  { %v657_v33 = vpop.f32.mrf.mxu1 }
 0x27e   :  { %v253_v38 = vadd.f32 %v657_v33, %v25_v35 }
 0x27f   :  { %v247_v36 = vpop.f32.mrf.mxu1 }
 0x280   :  { %v248_v37 = vadd.f32 %v247_v36, %v24_v34  ;;  %v265_v40 = vsel %vm34_vm0, %v253_v38, -inf }
 0x282   :  { %v262_v39 = vsel %vm34_vm0, %v248_v37, -inf }
 0x283   :  { %263 = vmax.xlane.f32.xlu0 %v262_v39 }
 0x287   :  { %266 = vmax.xlane.f32.xlu0 %v265_v40 }
 0x29d   :  { %v261_v41 = vpop.xlane.xlu1 %260 }
 0x29e   :  { %v269_v42 = vsub.f32 %v243_v28, %v261_v41 }
 0x29f   :  { %v258_v43 = vpop.xlane.xlu0 %257 }
 0x2a0   :  { %v274_v44 = vmul.f32 1.442695, %v269_v42  ;;  %v268_v45 = vsub.f32 %v238_v30, %v258_v43 }
 0x2a2   :  { %692 = vpow2.f32 %v274_v44  ;;  %v272_v46 = vmul.f32 1.442695, %v268_v45 }
 0x2a4   :  { %694 = vpow2.f32 %v272_v46 }
 0x2af   :  { %v693_v47 = vpop.eup %692 }
 0x2b0   :  { %v283_v48 = vsel %vm34_vm0, %v693_v47, 0.0 }
 0x2b1   :  { %v695_v49 = vpop.eup %694  ;;  %284 = vadd.xlane.f32.xlu0 %v283_v48 }
 0x2b2   :  { %v280_v50 = vsel %vm34_vm0, %v695_v49, 0.0 }
 0x2b3   :  { %281 = vadd.xlane.f32.xlu1 %v280_v50 }
 0x30c   :  { %v264_v51 = vpop.xlane.xlu0 %263 }
 0x30d   :  { %v270_v52 = vsub.f32 %v248_v37, %v264_v51 }
 0x30f   :  { %v276_v53 = vmul.f32 1.442695, %v270_v52 }
 0x310   :  { %v267_v54 = vpop.xlane.xlu0 %266 }
 0x311   :  { %696 = vpow2.f32 %v276_v53  ;;  %v271_v55 = vsub.f32 %v253_v38, %v267_v54 }
 0x313   :  { %v278_v56 = vmul.f32 1.442695, %v271_v55 }
 0x315   :  { %698 = vpow2.f32 %v278_v56 }
 0x31e   :  { %v697_v57 = vpop.eup %696 }
 0x31f   :  { %v286_v58 = vsel %vm34_vm0, %v697_v57, 0.0 }
 0x320   :  { %287 = vadd.xlane.f32.xlu1 %v286_v58 }
 0x322   :  { %v699_v59 = vpop.eup %698 }
 0x323   :  { %v289_v60 = vsel %vm34_vm0, %v699_v59, 0.0 }
 0x324   :  { %290 = vadd.xlane.f32.xlu0 %v289_v60 }
 0x33a   :  { %v285_v61 = vpop.xlane.xlu0 %284 }
 0x33b   :  { %700 = vrcp.f32 %v285_v61 }
 0x33c   :  { %v282_v62 = vpop.xlane.xlu1 %281 }
 0x33d   :  { %702 = vrcp.f32 %v282_v62 }
 0x348   :  { %v701_v63 = vpop.eup %700 }
 0x349   :  { %v823_v2 = vmul.f32 %v701_v63, %v693_v47 }
 0x34a   :  { %v703_v0 = vpop.eup %702 }
 0x34b   :  { %v821_v1 = vmul.f32 %v703_v0, %v695_v49  ;;  %v597_v49 = vld [vmem:[%s871_s1 + $0x48] ss:$0 sm:$0xff] }
 0x34d   :  { %666 = vmatprep.mubr.msk.f32.mxu0 %vm34_vm0, %v821_v1 }
 0x34e   :  { %667 = vmatmul.mubr.msk.f32.vlgmr.msra.gmra.mxu0 %vm34_vm0, %v823_v2 }
 0x34f   :  { %673 = vmatpush3.msra.mxu0 %v20_v9 }
 0x350   :  { %674 = vmatprep.subr.mxu0 %v19_v10 }
 0x351   :  { %675 = vmatpush3.msra.mxu0 %v19_v10 }
 0x352   :  { %676 = vmatprep.subr.mxu0 %v18_v11 }
 0x353   :  { %677 = vmatpush3.msra.mxu0 %v18_v11 }
 0x354   :  { %678 = vmatprep.subr.mxu0 %v17_v12 }
 0x355   :  { %679 = vmatpush3.msra.mxu0 %v17_v12 }
 0x3a9   :  { %v288_v3 = vpop.xlane.xlu1 %287 }
 0x3aa   :  { %704 = vrcp.f32 %v288_v3 }
 0x3ad   :  { %v291_v4 = vpop.xlane.xlu0 %290 }
 0x3ae   :  { %706 = vrcp.f32 %v291_v4 }
 0x3b7   :  { %v705_v5 = vpop.eup %704 }
 0x3b8   :  { %v297_v6 = vmul.f32 %v705_v5, %v697_v57 }
 0x3ba   :  { %669 = vmatprep.mubr.msk.f32.mxu0 %vm34_vm0, %v297_v6 }
 0x3bb   :  { %v707_v7 = vpop.eup %706 }
 0x3bc   :  { %v299_v8 = vmul.f32 %v707_v7, %v699_v59 }
 0x3be   :  { %670 = vmatmul.mubr.msk.f32.gmra.mxu0 %vm34_vm0, %v299_v8 }
 0x40e   :  { %v668_v13 = vpop.f32.mrf.mxu0 }
 0x410   :  { %v378_v14 = vpop.f32.mrf.mxu0 }
 0x47e   :  { %v671_v15 = vpop.f32.mrf.mxu0 }
 0x47f   :  { %401 = vrot.lane.b32.xlu0 %v671_v15, %s732_s16 }
 0x480   :  { %v388_v16 = vpop.f32.mrf.mxu0 }
 0x481   :  { %399 = vrot.lane.b32.xlu1 %v388_v16, %s732_s16 }
 0x483   :  { %514 = vrot.lane.b32.xlu0 %v297_v6, %s730_s27 }
 0x485   :  { %498 = vrot.lane.b32.xlu1 %v297_v6, %s733_s17 }
 0x487   :  { %530 = vrot.lane.b32.xlu0 %v297_v6, %s734_s18 }
 0x489   :  { %500 = vrot.lane.b32.xlu1 %v299_v8, %s733_s17 }
 0x48b   :  { %494 = vrot.lane.b32.xlu0 %v821_v1, %s733_s17 }
 0x48d   :  { %516 = vrot.lane.b32.xlu1 %v299_v8, %s730_s27 }
 0x48f   :  { %510 = vrot.lane.b32.xlu0 %v821_v1, %s730_s27 }
 0x491   :  { %532 = vrot.lane.b32.xlu1 %v299_v8, %s734_s18 }
 0x493   :  { %526 = vrot.lane.b32.xlu0 %v821_v1, %s734_s18 }
 0x495   :  { %496 = vrot.lane.b32.xlu1 %v823_v2, %s733_s17 }
 0x499   :  { %512 = vrot.lane.b32.xlu1 %v823_v2, %s730_s27 }
 0x49d   :  { %528 = vrot.lane.b32.xlu1 %v823_v2, %s734_s18 }
 0x4f1   :  { %v402_v17 = vpop.permute.xlu0 %401 }
 0x4f2   :  { %v406_v20 = vsel %vm154_vm1, %v668_v13, %v402_v17 }
 0x4f3   :  { %v400_v18 = vpop.permute.xlu1 %399 }
 0x4f4   :  { %v405_v19 = vsel %vm154_vm1, %v378_v14, %v400_v18 }
 0x4f5   :  { %v515_v21 = vpop.permute.xlu0 %514  ;;  %680 = vmatprep.mubr.msk.f32.mxu0 %vm34_vm0, %v405_v19 }
 0x4f6   :  { %681 = vmatmul.mubr.msk.f32.vlgmr.msra.gmra.mxu0 %vm34_vm0, %v406_v20 }
 0x4f7   :  { %v499_v22 = vpop.permute.xlu1 %498 }
 0x4f8   :  { %v508_v23 = vadd.f32 %v499_v22, %v297_v6 }
 0x4f9   :  { %v531_v25 = vpop.permute.xlu0 %530 }
 0x4fa   :  { %v524_v24 = vadd.f32 %v515_v21, %v508_v23 }
 0x4fb   :  { %v501_v26 = vpop.permute.xlu1 %500 }
 0x4fc   :  { %v540_v27 = vadd.f32 %v531_v25, %v524_v24  ;;  %v509_v29 = vadd.f32 %v501_v26, %v299_v8 }
 0x4fd   :  { %v495_v33 = vpop.permute.xlu0 %494 }
 0x4fe   :  { %544 = vrot.lane.b32.xlu0 %v540_v27, %s735_s19  ;;  %v506_v36 = vadd.f32 %v495_v33, %v821_v1 }
 0x4ff   :  { %v517_v28 = vpop.permute.xlu1 %516 }
 0x500   :  { %v525_v30 = vadd.f32 %v517_v28, %v509_v29 }
 0x501   :  { %v511_v34 = vpop.permute.xlu0 %510 }
 0x502   :  { %v522_v38 = vadd.f32 %v511_v34, %v506_v36 }
 0x503   :  { %v533_v31 = vpop.permute.xlu1 %532 }
 0x504   :  { %v541_v32 = vadd.f32 %v533_v31, %v525_v30 }
 0x505   :  { %v527_v37 = vpop.permute.xlu0 %526 }
 0x506   :  { %546 = vrot.lane.b32.xlu1 %v541_v32, %s735_s19  ;;  %v538_v40 = vadd.f32 %v527_v37, %v522_v38 }
 0x507   :  { %v497_v35 = vpop.permute.xlu1 %496 }
 0x508   :  { %v507_v43 = vadd.f32 %v497_v35, %v823_v2 }
 0x50b   :  { %v513_v39 = vpop.permute.xlu1 %512 }
 0x50c   :  { %v523_v45 = vadd.f32 %v513_v39, %v507_v43 }
 0x50f   :  { %v529_v44 = vpop.permute.xlu1 %528 }
 0x510   :  { %v539_v46 = vadd.f32 %v529_v44, %v523_v45 }
 0x570   :  { %v545_v41 = vpop.permute.xlu0 %544 }
 0x571   :  { %v551_v42 = vsel %vm550_vm2, %v538_v40, %v545_v41 }
 0x572   :  { %555 = vrot.lane.b32.xlu0 %v551_v42, %s736_s20 }
 0x578   :  { %v547_v47 = vpop.permute.xlu1 %546 }
 0x579   :  { %v552_v48 = vsel %vm550_vm2, %v539_v46, %v547_v47 }
 0x57a   :  { %557 = vrot.lane.b32.xlu1 %v552_v48, %s736_s20 }
 0x5b6   :  { %v682_v50 = vpop.f32.mrf.mxu0 }
 0x5b7   :  { %v489_v51 = vadd.f32 %v682_v50, %v597_v49 }
 0x5b8   :  { %v483_v52 = vpop.f32.mrf.mxu0 }
 0x5b9   :  { %493 = vst.msk [vmem:[#allocation2 + $0x8] sm:$0xff] %vm34_vm0, %v489_v51  ;;  %v484_v53 = vadd.f32 %v597_v49, %v483_v52 }
 0x5bb   :  { %492 = vst.msk [vmem:[#allocation2] sm:$0xff] %vm34_vm0, %v484_v53 }
 0x5e4   :  { %v556_v54 = vpop.permute.xlu0 %555 }
 0x5e5   :  { %562 = vst.msk [vmem:[#allocation2] sm:$0xff] %vm561_vm3, %v556_v54 }
 0x5ec   :  { %v558_v55 = vpop.permute.xlu1 %557 }
 0x5ed   :  { %563 = vst.msk [vmem:[#allocation2 + $0x8] sm:$0xff] %vm561_vm3, %v558_v55 }
 0x5ee   :  { %719 = shalt.err (!%p716_p4)
}
 0x5ef   :  { %s738_s1 = smov 128  }
 0x5f0   :  { %575 = dma.vmem_to_hbm [thread:$0]  %s570_s24, 256, %s872_s2, [#allocation3], %s738_s1, %s738_s1, %s735_s19  }
 0x5f1   :  { %728 = dma.done.wait [#allocation3], 256  }
 0x5f2   :  { %729 = vsyncadd [#allocation3], 4294967040 }
 0x5f3   :  { %579 = vsyncpa [#allocation3], 1 }

</bundles_post_ra>
